<compile_context>
chip_gen: v5e
topology: v5e:2x2
jax: 0.10.0
libtpu: 0.0.40
codegen_flags: <defaults>
</compile_context>

<pallas_src>
import functools

import jax
import jax.numpy as jnp
from jax.experimental import pallas as pl
from jax.experimental.pallas import tpu as pltpu

LEAK = 0.01   # nn.LeakyReLU default negative_slope
K = 5         # conv kernel size
P = 2         # conv padding


def _leaky(x):
    return jnp.where(x >= 0, x, LEAK * x)


def disc_kernel(x_ref, w1_ref, b1_ref, w2_ref, b2_ref,
                wl1_ref, bl1_ref, wl2t_ref, bl2_ref, o_ref, *, t_total):
    # x_ref   : (1, 1, tWin, Cin) raw f32 input window, tWin = tT + 4*P (conv1+conv2 halo)
    # w1_ref  : (K, Cin, C1) bf16, b1_ref: (1, C1) f32
    # w2_ref  : (K*C1, C2) bf16,  b2_ref: (1, C2) f32
    # wl1_ref : (C2, Hp) bf16,    bl1_ref: (1, Hp) f32
    # wl2t_ref: (1, Hp) bf16,     bl2_ref: (1, 1) f32
    # o_ref   : (1, 1, 1, tT)   -- time tile on the lane axis (lane-dense store)
    tT = o_ref.shape[3]
    tH1 = tT + 2 * P                                       # conv2 halo rows of h1
    C1 = w1_ref.shape[2]

    x = x_ref[0, 0]                                        # (tWin, Cin) f32

    # ---- conv1 (k=5, s=1, p=2) + LeakyReLU: K tap matmuls, bf16 operands / f32 acc ----
    acc1 = jnp.zeros((tH1, C1), jnp.float32)
    for k in range(K):                                     # K static -> unrolled
        acc1 += jnp.dot(x[k:k + tH1, :].astype(jnp.bfloat16), w1_ref[k],
                        preferred_element_type=jnp.float32)
    h1 = _leaky(acc1 + b1_ref[...])                        # (tH1, C1) f32

    # Zero the halo rows that fall outside the real sequence so conv2 sees true zero
    # padding (matches the PyTorch Conv1d zero padding between the two convs).
    row0 = pl.program_id(1) * tT - P                       # global index of h1 row 0
    gidx = row0 + jax.lax.broadcasted_iota(jnp.int32, (tH1, 1), 0)
    h1 = jnp.where((gidx >= 0) & (gidx < t_total), h1, 0.0)

    # ---- conv2 (k=5, s=1, p=2) + LeakyReLU: one deep K*C1 = 640 contraction ----
    # Taps are 128-lane-aligned slices of h1 -> lane-dense concat, then a single MXU pass.
    x2 = jnp.concatenate([h1[k:k + tT, :] for k in range(K)], axis=-1)   # (tT, K*C1) f32
    h2 = _leaky(jnp.dot(x2.astype(jnp.bfloat16), w2_ref[...],
                        preferred_element_type=jnp.float32) + b2_ref[...])   # (tT, C2)

    # ---- MLP head: Linear -> LeakyReLU -> Linear(H,1) -> sigmoid ----
    z1 = _leaky(jnp.dot(h2.astype(jnp.bfloat16), wl1_ref[...],
                        preferred_element_type=jnp.float32) + bl1_ref[...])  # (tT, Hp)
    # (1,Hp) contracted against (tT,Hp) on Hp -> (1,tT): result produced directly in
    # lane-dense layout, so the store below is an unmasked lane-dense vst.
    z2 = jax.lax.dot_general(wl2t_ref[...], z1.astype(jnp.bfloat16),
                             dimension_numbers=(((1,), (1,)), ((), ())),
                             preferred_element_type=jnp.float32)   # (1, tT)
    o_ref[...] = jax.nn.sigmoid(z2 + bl2_ref[...]).reshape(1, 1, 1, tT)


def discriminator_cnn(x, params, tile_t=512):
    """x: (B, T, feat_dim) float32 -> (B, T, 1) float32."""
    w1, b1, w2, b2, wl1, bl1, wl2, bl2 = params
    B, T, Cin = x.shape
    C1 = w1.shape[2]
    C2 = w2.shape[2]
    H = wl1.shape[1]

    # Time tile: multiple of 8 (sublanes). Default 512 amortizes per-grid-step overhead;
    # per-tile intermediates (h1 ~0.3 MiB, x2 ~1.3 MiB, z1 tT*Hp*4) stay a few MiB.
    if T <= tile_t:
        tT = max(8, ((T + 7) // 8) * 8)
    else:
        tT = tile_t
    nT = pl.cdiv(T, tT)
    Tpad = nT * tT
    tWin = tT + 4 * P                      # raw input rows per tile (conv1+conv2 halo)

    # Pad hidden dim to a lane-dense multiple of 128 (zero pad -> identical math).
    Hp = max(128, ((H + 127) // 128) * 128)
    if Hp != H:
        wl1 = jnp.pad(wl1, ((0, 0), (0, Hp - H)))
        bl1 = jnp.pad(bl1, ((0, 0), (0, Hp - H)))
        wl2 = jnp.pad(wl2, ((0, Hp - H), (0, 0)))

    # ---- wrapper-side layout plumbing: zero pad + raw overlapping windows ----
    x_pad = jnp.pad(x, ((0, 0), (2 * P, 2 * P + (Tpad - T)), (0, 0)))
    # Raw windows with a 2*P halo each side (overlap ~ (4P)/tT, vs the old 5x im2col).
    x_win = jnp.stack([x_pad[:, j * tT: j * tT + tWin, :] for j in range(nT)],
                      axis=1)                                  # (B, nT, tWin, Cin) f32

    # Weights cast to bf16 once; biases stay f32 (added after the f32 accumulate).
    w1_b = w1.astype(jnp.bfloat16)                             # (K, Cin, C1)
    w2_f = w2.reshape(K * C1, C2).astype(jnp.bfloat16)         # k-major tap order
    wl1_b = wl1.astype(jnp.bfloat16)                           # (C2, Hp)
    wl2_t = wl2.T.astype(jnp.bfloat16)                         # (1, Hp)

    kern = functools.partial(disc_kernel, t_total=T)

    flops = 2 * B * Tpad * (K * Cin * C1 + K * C1 * C2 + C2 * Hp + Hp)
    bytes_accessed = (x_win.size * 4 + B * Tpad * 4
                      + (w1_b.size + w2_f.size + wl1_b.size + wl2_t.size) * 2
                      + (b1.size + b2.size + bl1.size + bl2.size) * 4)
    cost = pl.CostEstimate(flops=flops, transcendentals=B * Tpad,
                           bytes_accessed=bytes_accessed)

    out = pl.pallas_call(
        kern,
        out_shape=jax.ShapeDtypeStruct((B, nT, 1, tT), jnp.float32),
        grid_spec=pltpu.PrefetchScalarGridSpec(
            num_scalar_prefetch=0,
            grid=(B, nT),
            in_specs=[
                pl.BlockSpec((1, 1, tWin, Cin), lambda b, j: (b, j, 0, 0)),
                # weights / biases: constant block index -> fetched once, revisited.
                pl.BlockSpec((K, Cin, C1), lambda b, j: (0, 0, 0)),
                pl.BlockSpec((1, C1), lambda b, j: (0, 0)),
                pl.BlockSpec((K * C1, C2), lambda b, j: (0, 0)),
                pl.BlockSpec((1, C2), lambda b, j: (0, 0)),
                pl.BlockSpec((C2, Hp), lambda b, j: (0, 0)),
                pl.BlockSpec((1, Hp), lambda b, j: (0, 0)),
                pl.BlockSpec((1, Hp), lambda b, j: (0, 0)),
                pl.BlockSpec((1, 1), lambda b, j: (0, 0)),
            ],
            out_specs=pl.BlockSpec((1, 1, 1, tT), lambda b, j: (b, j, 0, 0)),
        ),
        compiler_params=pltpu.CompilerParams(
            dimension_semantics=("parallel", "parallel"),
            vmem_limit_bytes=48 * 1024 * 1024),
        cost_estimate=cost,
    )(x_win, w1_b, b1, w2_f, b2, wl1_b, bl1, wl2_t, bl2)

    return out.reshape(B, Tpad)[:, :T, None]               # (B, T, 1)


def reference(x, params):
    """Pure-JAX f32 reference (same math) for correctness checking."""
    w1, b1, w2, b2, wl1, bl1, wl2, bl2 = params
    B, T, _ = x.shape

    def conv1d(inp, w, b):  # inp (B,T,Ci), w (K,Ci,Co)
        ip = jnp.pad(inp, ((0, 0), (P, P), (0, 0)))
        acc = jnp.zeros((B, T, w.shape[2]), jnp.float32)
        for k in range(K):
            acc += jnp.einsum('bti,io->bto', ip[:, k:k + T, :], w[k])
        return _leaky(acc + b)

    h = conv1d(x, w1, b1)
    h = conv1d(h, w2, b2)
    z = _leaky(jnp.einsum('btc,ch->bth', h, wl1) + bl1)
    z = jnp.einsum('bth,ho->bto', z, wl2) + bl2
    return jax.nn.sigmoid(z)


def init_params(key, feat_dim, hidden_dim):
    C1, C2 = 128, 256  # hard-coded in the module
    ks = jax.random.split(key, 8)
    s = 0.05
    w1 = s * jax.random.normal(ks[0], (K, feat_dim, C1), jnp.float32)
    b1 = s * jax.random.normal(ks[1], (1, C1), jnp.float32)
    w2 = s * jax.random.normal(ks[2], (K, C1, C2), jnp.float32)
    b2 = s * jax.random.normal(ks[3], (1, C2), jnp.float32)
    wl1 = s * jax.random.normal(ks[4], (C2, hidden_dim), jnp.float32)
    bl1 = s * jax.random.normal(ks[5], (1, hidden_dim), jnp.float32)
    wl2 = s * jax.random.normal(ks[6], (hidden_dim, 1), jnp.float32)
    bl2 = s * jax.random.normal(ks[7], (1, 1), jnp.float32)
    return (w1, b1, w2, b2, wl1, bl1, wl2, bl2)


if __name__ == "__main__":
    key = jax.random.PRNGKey(0)
    kx1, kx2, kp = jax.random.split(key, 3)

    # bf16 MXU operands (f32 accumulate) -> compare against the f32 reference at ~1e-2.
    TOL = dict(atol=2e-2, rtol=2e-2)

    # Test 1: small shapes, single time tile.
    B, T, FEAT, HIDDEN = 2, 8, 16, 32
    params = init_params(kp, FEAT, HIDDEN)
    x = jax.random.normal(kx1, (B, T, FEAT), jnp.float32)
    out = jax.block_until_ready(discriminator_cnn(x, params))
    ref = reference(x, params)
    assert out.shape == (B, T, 1)
    assert jnp.allclose(out, ref, **TOL), "mismatch vs reference (single tile)"

    # Test 2: multi-tile time axis with a ragged last tile (exercises halo + masking).
    T2 = 40
    x2 = jax.random.normal(kx2, (B, T2, FEAT), jnp.float32)
    out2 = jax.block_until_ready(discriminator_cnn(x2, params, tile_t=16))
    ref2 = reference(x2, params)
    assert out2.shape == (B, T2, 1)
    assert jnp.allclose(out2, ref2, **TOL), "mismatch vs reference (multi tile)"

    print("KERNEL_OK")
</pallas_src>

<mosaic_0001>
module attributes {stable_mosaic.version = 11 : i64} {
  func.func @disc_kernel(%arg0: i32, %arg1: i32, %arg2: memref<1x1x16x16xf32, #tpu.memory_space<vmem>>, %arg3: memref<5x16x128xbf16, #tpu.memory_space<vmem>>, %arg4: memref<1x128xf32, #tpu.memory_space<vmem>>, %arg5: memref<640x256xbf16, #tpu.memory_space<vmem>>, %arg6: memref<1x256xf32, #tpu.memory_space<vmem>>, %arg7: memref<256x128xbf16, #tpu.memory_space<vmem>>, %arg8: memref<1x128xf32, #tpu.memory_space<vmem>>, %arg9: memref<1x128xbf16, #tpu.memory_space<vmem>>, %arg10: memref<1x1xf32, #tpu.memory_space<vmem>>, %arg11: memref<1x1x1x8xf32, #tpu.memory_space<vmem>>) attributes {dimension_semantics = [#tpu.dimension_semantics<parallel>, #tpu.dimension_semantics<parallel>], iteration_bounds = array<i64: 2, 1>, scalar_prefetch = 0 : i64, scratch_operands = 0 : i64, tpu.core_type = #tpu.core_type<tc>, window_params = [{transform_indices = @transform_0, window_bounds = array<i64: 1, 1, 16, 16>}, {pipeline_mode = #tpu.pipeline_mode<synchronous>, transform_indices = @transform_1, window_bounds = array<i64: 5, 16, 128>}, {pipeline_mode = #tpu.pipeline_mode<synchronous>, transform_indices = @transform_2, window_bounds = array<i64: 1, 128>}, {pipeline_mode = #tpu.pipeline_mode<synchronous>, transform_indices = @transform_3, window_bounds = array<i64: 640, 256>}, {pipeline_mode = #tpu.pipeline_mode<synchronous>, transform_indices = @transform_4, window_bounds = array<i64: 1, 256>}, {pipeline_mode = #tpu.pipeline_mode<synchronous>, transform_indices = @transform_5, window_bounds = array<i64: 256, 128>}, {pipeline_mode = #tpu.pipeline_mode<synchronous>, transform_indices = @transform_6, window_bounds = array<i64: 1, 128>}, {pipeline_mode = #tpu.pipeline_mode<synchronous>, transform_indices = @transform_7, window_bounds = array<i64: 1, 128>}, {pipeline_mode = #tpu.pipeline_mode<synchronous>, transform_indices = @transform_8, window_bounds = array<i64: 1, 1>}, {transform_indices = @transform_9, window_bounds = array<i64: 1, 1, 1, 8>}]} {
    %c0 = arith.constant 0 : index
    %c0_0 = arith.constant 0 : index
    %c0_1 = arith.constant 0 : index
    %c0_2 = arith.constant 0 : index
    %0 = vector.load %arg2[%c0, %c0_0, %c0_1, %c0_2] : memref<1x1x16x16xf32, #tpu.memory_space<vmem>>, vector<1x1x16x16xf32>
    %1 = vector.shape_cast %0 : vector<1x1x16x16xf32> to vector<16x16xf32>
    %cst = arith.constant 0.000000e+00 : f32
    %2 = vector.broadcast %cst : f32 to vector<12x128xf32>
    %3 = vector.extract_strided_slice %1 {offsets = [0, 0], sizes = [12, 16], strides = [1, 1]} : vector<16x16xf32> to vector<12x16xf32>
    %4 = arith.truncf %3 : vector<12x16xf32> to vector<12x16xbf16>
    %c0_3 = arith.constant 0 : index
    %c0_4 = arith.constant 0 : index
    %c0_5 = arith.constant 0 : index
    %5 = vector.load %arg3[%c0_3, %c0_4, %c0_5] : memref<5x16x128xbf16, #tpu.memory_space<vmem>>, vector<1x16x128xbf16>
    %6 = vector.shape_cast %5 : vector<1x16x128xbf16> to vector<16x128xbf16>
    %cst_6 = arith.constant dense<0.000000e+00> : vector<12x128xf32>
    %7 = tpu.matmul %4, %6, %cst_6 {dimension_numbers = #tpu.dot_dimension_numbers<[1], [0], [0], [1], [0, 0, 1, 1], [], []>} : vector<12x16xbf16>, vector<16x128xbf16>, vector<12x128xf32> -> vector<12x128xf32>
    %8 = arith.addf %2, %7 : vector<12x128xf32>
    %9 = vector.extract_strided_slice %1 {offsets = [1, 0], sizes = [12, 16], strides = [1, 1]} : vector<16x16xf32> to vector<12x16xf32>
    %10 = arith.truncf %9 : vector<12x16xf32> to vector<12x16xbf16>
    %c1 = arith.constant 1 : index
    %c0_7 = arith.constant 0 : index
    %c0_8 = arith.constant 0 : index
    %11 = vector.load %arg3[%c1, %c0_7, %c0_8] : memref<5x16x128xbf16, #tpu.memory_space<vmem>>, vector<1x16x128xbf16>
    %12 = vector.shape_cast %11 : vector<1x16x128xbf16> to vector<16x128xbf16>
    %cst_9 = arith.constant dense<0.000000e+00> : vector<12x128xf32>
    %13 = tpu.matmul %10, %12, %cst_9 {dimension_numbers = #tpu.dot_dimension_numbers<[1], [0], [0], [1], [0, 0, 1, 1], [], []>} : vector<12x16xbf16>, vector<16x128xbf16>, vector<12x128xf32> -> vector<12x128xf32>
    %14 = arith.addf %8, %13 : vector<12x128xf32>
    %15 = vector.extract_strided_slice %1 {offsets = [2, 0], sizes = [12, 16], strides = [1, 1]} : vector<16x16xf32> to vector<12x16xf32>
    %16 = arith.truncf %15 : vector<12x16xf32> to vector<12x16xbf16>
    %c2 = arith.constant 2 : index
    %c0_10 = arith.constant 0 : index
    %c0_11 = arith.constant 0 : index
    %17 = vector.load %arg3[%c2, %c0_10, %c0_11] : memref<5x16x128xbf16, #tpu.memory_space<vmem>>, vector<1x16x128xbf16>
    %18 = vector.shape_cast %17 : vector<1x16x128xbf16> to vector<16x128xbf16>
    %cst_12 = arith.constant dense<0.000000e+00> : vector<12x128xf32>
    %19 = tpu.matmul %16, %18, %cst_12 {dimension_numbers = #tpu.dot_dimension_numbers<[1], [0], [0], [1], [0, 0, 1, 1], [], []>} : vector<12x16xbf16>, vector<16x128xbf16>, vector<12x128xf32> -> vector<12x128xf32>
    %20 = arith.addf %14, %19 : vector<12x128xf32>
    %21 = vector.extract_strided_slice %1 {offsets = [3, 0], sizes = [12, 16], strides = [1, 1]} : vector<16x16xf32> to vector<12x16xf32>
    %22 = arith.truncf %21 : vector<12x16xf32> to vector<12x16xbf16>
    %c3 = arith.constant 3 : index
    %c0_13 = arith.constant 0 : index
    %c0_14 = arith.constant 0 : index
    %23 = vector.load %arg3[%c3, %c0_13, %c0_14] : memref<5x16x128xbf16, #tpu.memory_space<vmem>>, vector<1x16x128xbf16>
    %24 = vector.shape_cast %23 : vector<1x16x128xbf16> to vector<16x128xbf16>
    %cst_15 = arith.constant dense<0.000000e+00> : vector<12x128xf32>
    %25 = tpu.matmul %22, %24, %cst_15 {dimension_numbers = #tpu.dot_dimension_numbers<[1], [0], [0], [1], [0, 0, 1, 1], [], []>} : vector<12x16xbf16>, vector<16x128xbf16>, vector<12x128xf32> -> vector<12x128xf32>
    %26 = arith.addf %20, %25 : vector<12x128xf32>
    %27 = vector.extract_strided_slice %1 {offsets = [4, 0], sizes = [12, 16], strides = [1, 1]} : vector<16x16xf32> to vector<12x16xf32>
    %28 = arith.truncf %27 : vector<12x16xf32> to vector<12x16xbf16>
    %c4 = arith.constant 4 : index
    %c0_16 = arith.constant 0 : index
    %c0_17 = arith.constant 0 : index
    %29 = vector.load %arg3[%c4, %c0_16, %c0_17] : memref<5x16x128xbf16, #tpu.memory_space<vmem>>, vector<1x16x128xbf16>
    %30 = vector.shape_cast %29 : vector<1x16x128xbf16> to vector<16x128xbf16>
    %cst_18 = arith.constant dense<0.000000e+00> : vector<12x128xf32>
    %31 = tpu.matmul %28, %30, %cst_18 {dimension_numbers = #tpu.dot_dimension_numbers<[1], [0], [0], [1], [0, 0, 1, 1], [], []>} : vector<12x16xbf16>, vector<16x128xbf16>, vector<12x128xf32> -> vector<12x128xf32>
    %32 = arith.addf %26, %31 : vector<12x128xf32>
    %c0_19 = arith.constant 0 : index
    %c0_20 = arith.constant 0 : index
    %33 = vector.load %arg4[%c0_19, %c0_20] : memref<1x128xf32, #tpu.memory_space<vmem>>, vector<1x128xf32>
    %34 = vector.broadcast %33 : vector<1x128xf32> to vector<12x128xf32>
    %35 = arith.addf %32, %34 : vector<12x128xf32>
    %cst_21 = arith.constant 0.000000e+00 : f32
    %36 = vector.broadcast %cst_21 : f32 to vector<12x128xf32>
    %37 = arith.cmpf oge, %35, %36 : vector<12x128xf32>
    %cst_22 = arith.constant 0.00999999977 : f32
    %38 = vector.broadcast %cst_22 : f32 to vector<12x128xf32>
    %39 = arith.mulf %38, %35 : vector<12x128xf32>
    %40 = arith.select %37, %35, %39 : vector<12x128xi1>, vector<12x128xf32>
    %c8_i32 = arith.constant 8 : i32
    %41 = arith.muli %arg1, %c8_i32 : i32
    %c2_i32 = arith.constant 2 : i32
    %42 = arith.subi %41, %c2_i32 : i32
    %43 = tpu.iota {dimensions = array<i32: 0>} : vector<12x1xi32>
    %44 = vector.broadcast %42 : i32 to vector<12x1xi32>
    %45 = arith.addi %44, %43 : vector<12x1xi32>
    %c0_i32 = arith.constant 0 : i32
    %46 = vector.broadcast %c0_i32 : i32 to vector<12x1xi32>
    %47 = arith.cmpi sge, %45, %46 : vector<12x1xi32>
    %c8_i32_23 = arith.constant 8 : i32
    %48 = vector.broadcast %c8_i32_23 : i32 to vector<12x1xi32>
    %49 = arith.cmpi slt, %45, %48 : vector<12x1xi32>
    %50 = arith.andi %47, %49 : vector<12x1xi1>
    %cst_24 = arith.constant 0.000000e+00 : f32
    %51 = vector.shape_cast %50 : vector<12x1xi1> to vector<12x1xi1>
    %52 = vector.broadcast %51 : vector<12x1xi1> to vector<12x128xi1>
    %53 = vector.broadcast %cst_24 : f32 to vector<12x128xf32>
    %54 = arith.select %52, %40, %53 : vector<12x128xi1>, vector<12x128xf32>
    %55 = vector.extract_strided_slice %54 {offsets = [0, 0], sizes = [8, 128], strides = [1, 1]} : vector<12x128xf32> to vector<8x128xf32>
    %56 = vector.extract_strided_slice %54 {offsets = [1, 0], sizes = [8, 128], strides = [1, 1]} : vector<12x128xf32> to vector<8x128xf32>
    %57 = vector.extract_strided_slice %54 {offsets = [2, 0], sizes = [8, 128], strides = [1, 1]} : vector<12x128xf32> to vector<8x128xf32>
    %58 = vector.extract_strided_slice %54 {offsets = [3, 0], sizes = [8, 128], strides = [1, 1]} : vector<12x128xf32> to vector<8x128xf32>
    %59 = vector.extract_strided_slice %54 {offsets = [4, 0], sizes = [8, 128], strides = [1, 1]} : vector<12x128xf32> to vector<8x128xf32>
    %60 = tpu.concatenate %55, %56, %57, %58, %59 in 1 : vector<8x128xf32>, vector<8x128xf32>, vector<8x128xf32>, vector<8x128xf32>, vector<8x128xf32> -> vector<8x640xf32>
    %61 = arith.truncf %60 : vector<8x640xf32> to vector<8x640xbf16>
    %c0_25 = arith.constant 0 : index
    %c0_26 = arith.constant 0 : index
    %62 = vector.load %arg5[%c0_25, %c0_26] : memref<640x256xbf16, #tpu.memory_space<vmem>>, vector<640x256xbf16>
    %cst_27 = arith.constant dense<0.000000e+00> : vector<8x256xf32>
    %63 = tpu.matmul %61, %62, %cst_27 {dimension_numbers = #tpu.dot_dimension_numbers<[1], [0], [0], [1], [0, 0, 1, 1], [], []>} : vector<8x640xbf16>, vector<640x256xbf16>, vector<8x256xf32> -> vector<8x256xf32>
    %c0_28 = arith.constant 0 : index
    %c0_29 = arith.constant 0 : index
    %64 = vector.load %arg6[%c0_28, %c0_29] : memref<1x256xf32, #tpu.memory_space<vmem>>, vector<1x256xf32>
    %65 = vector.broadcast %64 : vector<1x256xf32> to vector<8x256xf32>
    %66 = arith.addf %63, %65 : vector<8x256xf32>
    %cst_30 = arith.constant 0.000000e+00 : f32
    %67 = vector.broadcast %cst_30 : f32 to vector<8x256xf32>
    %68 = arith.cmpf oge, %66, %67 : vector<8x256xf32>
    %cst_31 = arith.constant 0.00999999977 : f32
    %69 = vector.broadcast %cst_31 : f32 to vector<8x256xf32>
    %70 = arith.mulf %69, %66 : vector<8x256xf32>
    %71 = arith.select %68, %66, %70 : vector<8x256xi1>, vector<8x256xf32>
    %72 = arith.truncf %71 : vector<8x256xf32> to vector<8x256xbf16>
    %c0_32 = arith.constant 0 : index
    %c0_33 = arith.constant 0 : index
    %73 = vector.load %arg7[%c0_32, %c0_33] : memref<256x128xbf16, #tpu.memory_space<vmem>>, vector<256x128xbf16>
    %cst_34 = arith.constant dense<0.000000e+00> : vector<8x128xf32>
    %74 = tpu.matmul %72, %73, %cst_34 {dimension_numbers = #tpu.dot_dimension_numbers<[1], [0], [0], [1], [0, 0, 1, 1], [], []>} : vector<8x256xbf16>, vector<256x128xbf16>, vector<8x128xf32> -> vector<8x128xf32>
    %c0_35 = arith.constant 0 : index
    %c0_36 = arith.constant 0 : index
    %75 = vector.load %arg8[%c0_35, %c0_36] : memref<1x128xf32, #tpu.memory_space<vmem>>, vector<1x128xf32>
    %76 = vector.broadcast %75 : vector<1x128xf32> to vector<8x128xf32>
    %77 = arith.addf %74, %76 : vector<8x128xf32>
    %cst_37 = arith.constant 0.000000e+00 : f32
    %78 = vector.broadcast %cst_37 : f32 to vector<8x128xf32>
    %79 = arith.cmpf oge, %77, %78 : vector<8x128xf32>
    %cst_38 = arith.constant 0.00999999977 : f32
    %80 = vector.broadcast %cst_38 : f32 to vector<8x128xf32>
    %81 = arith.mulf %80, %77 : vector<8x128xf32>
    %82 = arith.select %79, %77, %81 : vector<8x128xi1>, vector<8x128xf32>
    %c0_39 = arith.constant 0 : index
    %c0_40 = arith.constant 0 : index
    %83 = vector.load %arg9[%c0_39, %c0_40] : memref<1x128xbf16, #tpu.memory_space<vmem>>, vector<1x128xbf16>
    %84 = arith.truncf %82 : vector<8x128xf32> to vector<8x128xbf16>
    %cst_41 = arith.constant dense<0.000000e+00> : vector<1x8xf32>
    %85 = tpu.matmul %83, %84, %cst_41 {dimension_numbers = #tpu.dot_dimension_numbers<[1], [1], [0], [0], [0, 0, 1, 0], [], []>} : vector<1x128xbf16>, vector<8x128xbf16>, vector<1x8xf32> -> vector<1x8xf32>
    %c0_42 = arith.constant 0 : index
    %c0_43 = arith.constant 0 : index
    %86 = vector.load %arg10[%c0_42, %c0_43] : memref<1x1xf32, #tpu.memory_space<vmem>>, vector<1x1xf32>
    %87 = vector.broadcast %86 : vector<1x1xf32> to vector<1x8xf32>
    %88 = arith.addf %85, %87 : vector<1x8xf32>
    %89 = arith.negf %88 : vector<1x8xf32>
    %90 = math.exp %89 : vector<1x8xf32>
    %cst_44 = arith.constant 1.000000e+00 : f32
    %91 = vector.broadcast %cst_44 : f32 to vector<1x8xf32>
    %92 = arith.addf %91, %90 : vector<1x8xf32>
    %93 = arith.divf %91, %92 : vector<1x8xf32>
    %94 = vector.shape_cast %93 : vector<1x8xf32> to vector<1x1x1x8xf32>
    %c0_45 = arith.constant 0 : index
    %c0_46 = arith.constant 0 : index
    %c0_47 = arith.constant 0 : index
    %c0_48 = arith.constant 0 : index
    %95 = vector.load %arg11[%c0_45, %c0_46, %c0_47, %c0_48] : memref<1x1x1x8xf32, #tpu.memory_space<vmem>>, vector<1x1x1x8xf32>
    tpu.vector_store %arg11[%c0_45, %c0_46, %c0_47, %c0_48], %94 {strides = array<i32>} : memref<1x1x1x8xf32, #tpu.memory_space<vmem>>, vector<1x1x1x8xf32>,
    return
  }
  func.func @transform_0(%arg0: i32, %arg1: i32) -> (i32, i32, i32, i32) {
    %c0_i32 = arith.constant 0 : i32
    %c0_i32_0 = arith.constant 0 : i32
    %c0_i32_1 = arith.constant 0 : i32
    return %arg0, %arg1, %c0_i32, %c0_i32_0 : i32, i32, i32, i32
  }
  func.func @transform_1(%arg0: i32, %arg1: i32) -> (i32, i32, i32) {
    %c0_i32 = arith.constant 0 : i32
    %c0_i32_0 = arith.constant 0 : i32
    %c0_i32_1 = arith.constant 0 : i32
    %c0_i32_2 = arith.constant 0 : i32
    return %c0_i32, %c0_i32_0, %c0_i32_1 : i32, i32, i32
  }
  func.func @transform_2(%arg0: i32, %arg1: i32) -> (i32, i32) {
    %c0_i32 = arith.constant 0 : i32
    %c0_i32_0 = arith.constant 0 : i32
    %c0_i32_1 = arith.constant 0 : i32
    return %c0_i32, %c0_i32_0 : i32, i32
  }
  func.func @transform_3(%arg0: i32, %arg1: i32) -> (i32, i32) {
    %c0_i32 = arith.constant 0 : i32
    %c0_i32_0 = arith.constant 0 : i32
    %c0_i32_1 = arith.constant 0 : i32
    return %c0_i32, %c0_i32_0 : i32, i32
  }
  func.func @transform_4(%arg0: i32, %arg1: i32) -> (i32, i32) {
    %c0_i32 = arith.constant 0 : i32
    %c0_i32_0 = arith.constant 0 : i32
    %c0_i32_1 = arith.constant 0 : i32
    return %c0_i32, %c0_i32_0 : i32, i32
  }
  func.func @transform_5(%arg0: i32, %arg1: i32) -> (i32, i32) {
    %c0_i32 = arith.constant 0 : i32
    %c0_i32_0 = arith.constant 0 : i32
    %c0_i32_1 = arith.constant 0 : i32
    return %c0_i32, %c0_i32_0 : i32, i32
  }
  func.func @transform_6(%arg0: i32, %arg1: i32) -> (i32, i32) {
    %c0_i32 = arith.constant 0 : i32
    %c0_i32_0 = arith.constant 0 : i32
    %c0_i32_1 = arith.constant 0 : i32
    return %c0_i32, %c0_i32_0 : i32, i32
  }
  func.func @transform_7(%arg0: i32, %arg1: i32) -> (i32, i32) {
    %c0_i32 = arith.constant 0 : i32
    %c0_i32_0 = arith.constant 0 : i32
    %c0_i32_1 = arith.constant 0 : i32
    return %c0_i32, %c0_i32_0 : i32, i32
  }
  func.func @transform_8(%arg0: i32, %arg1: i32) -> (i32, i32) {
    %c0_i32 = arith.constant 0 : i32
    %c0_i32_0 = arith.constant 0 : i32
    %c0_i32_1 = arith.constant 0 : i32
    return %c0_i32, %c0_i32_0 : i32, i32
  }
  func.func @transform_9(%arg0: i32, %arg1: i32) -> (i32, i32, i32, i32) {
    %c0_i32 = arith.constant 0 : i32
    %c0_i32_0 = arith.constant 0 : i32
    %c0_i32_1 = arith.constant 0 : i32
    return %arg0, %arg1, %c0_i32, %c0_i32_0 : i32, i32, i32, i32
  }
}

</mosaic_0001>

<bundles_post_ra>
// kernel: tpu_custom_call.1
= control target key start
LH: loop header
LB: loop body
LE: loop exit
PB: predicated region body
PF: predicated region fallthrough
CT: control target
= control target key end

     0   :  { %s2715_s0 = inlined_call_operand.hbm [shape: f32[2,1,16,16], index: 0, kind: input, shape index: {}]   ;;  %s2716_s1 = inlined_call_operand.hbm [shape: bf16[5,16,128], index: 1, kind: input, shape index: {}]   ;;  %s2717_s2 = inlined_call_operand.vmem [shape: f32[1,128], index: 2, kind: input, shape index: {}]   ;;  %s2718_s3 = inlined_call_operand.hbm [shape: bf16[640,256], index: 3, kind: input, shape index: {}]   ;;  %s2719_s4 = inlined_call_operand.vmem [shape: f32[1,256], index: 4, kind: input, shape index: {}]   ;;  %s2720_s5 = inlined_call_operand.hbm [shape: bf16[256,128], index: 5, kind: input, shape index: {}]   ;;  %s2721_s6 = inlined_call_operand.vmem [shape: f32[1,128], index: 6, kind: input, shape index: {}]   ;;  %s2722_s7 = inlined_call_operand.vmem [shape: bf16[1,128], index: 7, kind: input, shape index: {}]   ;;  %s2723_s8 = inlined_call_operand.<no memory space> [shape: f32[1,1], index: 8, kind: input, shape index: {}]   ;;  %s2724_s9 = inlined_call_operand.hbm [shape: f32[2,1,1,8], index: 9, kind: output, shape index: {}]  }
   0x1   :  { %2730 = sst [smem:[#allocation19_spill]] %s2716_s1  ;;  %v14_v0 = vstv %s2723_s8 }
   0x2   :  { %2731 = sst [smem:[#allocation20_spill]] %s2718_s3  ;;  %15 = vst [vmem:[#allocation2] sm:$0x1] %v14_v0 }
   0x3   :  { %2732 = sst [smem:[#allocation21_spill]] %s2720_s5 }
   0x4   :  { %16 = vsyncpa [#allocation4], 0 }
   0x5   :  { %18 = vsyncpa [#allocation4 + $0x1], 0 }
   0x6   :  { %19 = vsyncpa [#allocation7], 0 }
   0x7   :  { %20 = vsyncpa [#allocation10], 0 }
   0x8   :  { %21 = vsyncpa [#allocation5], 0 }
   0x9   :  { %23 = vsyncpa [#allocation5 + $0x1], 0  ;;  %s2495_s11 = smov 0   ;;  %s2497_s12 = smov 0  }
   0xa   :  { %s2499_s13 = smov 0   ;;  %s2501_s14 = smov 0  }
   0xb   :  { %s2503_s15 = smov 0   ;;  %s2505_s16 = smov 0  }
   0xc LB: > { %2733 = sst [smem:[#allocation16_spill]] %s2412_s11  ;;  %s1582_s8 = sadd.s32 4294967295, %s2432_s16   ;;  %s2432_s16 = sphi %s2505_s16, %s29_s16   ;;  %s2428_s15 = sphi %s2503_s15, %s2758_s15   ;;  %s2424_s14 = sphi %s2501_s14, %s2757_s14   ;;  %s2420_s13 = sphi %s2499_s13, %s2756_s13   ;;  %s2416_s12 = sphi %s2497_s12, %s2755_s12   ;;  %s2412_s11 = sphi %s2495_s11, %s2754_s11  }
   0xd   : > { %s1583_s17 = sadd.s32 4294967294, %s2432_s16   ;;  %p63_p0 = scmp.ne.s32.totalorder %s2416_s12, %s2412_s11 }
   0xe   : > { %p2529_p1 = scmp.eq.s32.totalorder %s1582_s8, 0  ;;  %p2533_p2 = scmp.eq.s32.totalorder %s1582_s8, 1 }
   0xf   : > { %p263_p3 = scmp.eq.s32.totalorder %s1583_s17, 1  ;;  %p1584_p5 = scmp.ge.s32.totalorder %s2432_s16, 1 }
  0x10   : > { %p2539_p4 = por %p2529_p1, %p63_p0  ;;  %p270_p7 = scmp.lt.s32.totalorder %s2432_s16, 3 }
  0x11   : > { %p2544_p6 = por %p263_p3, %p63_p0  ;;  %s2739_s1 = sld [smem:[#allocation19_spill]] }
  0x12   : > { %p2552_p8 = pnand %p1584_p5, %p270_p7  ;;  %s2434_s26 = smov [#allocation6]  }
  0x13   : > { %s2737_s21 = scalar_select %p2544_p6, 1, 0 }
  0x14   : > { %p2133_p9 = pneg %p2552_p8  ;;  %s283_s27 = sshll.u32 %s2434_s26, 4  ;;  %s284_s27 = int_to_ptr.vmem [resolvable:$true] %s283_s27 }
  0x15   : > { %2738 = sst [smem:[#allocation17_spill]] %s2737_s21  ;;  %p1588_p11 = scmp.ge.s32.totalorder %s2432_s16, 2 }
  0x16   : > { %p2560_p10 = pnand %p2133_p9, %p2529_p1  ;;  %s2742_s3 = sld [smem:[#allocation20_spill]] }
  0x17   : > { %s281_s24 = sshll.u32 %s2739_s1, 4  ;;  %s2435_s8 = smov 64   ;;  %s282_s24 = int_to_ptr.hbm [resolvable:$true] %s281_s24 }
  0x18   : > { %s2436_s17 = smov 4   ;;  %s2437_s22 = smov [#allocation8]  }
  0x19   : > { %2136 = dma.hbm_to_vmem [thread:$0]  (!%p2560_p10), %s282_s24, 640, %s284_s27, [#allocation7], %s2435_s8, %s2435_s8, %s2436_s17  }
  0x1a   : > { %s300_s23 = sshll.u32 %s2437_s22, 4  ;;  %s2726_s26 = smov 128   ;;  %s301_s23 = int_to_ptr.vmem [resolvable:$true] %s300_s23 }
  0x1b   : > { %s2727_s1 = smov 8   ;;  %s2743_s5 = sld [smem:[#allocation21_spill]] }
  0x1c   : > { %s298_s10 = sshll.u32 %s2742_s3, 4  ;;  %s2440_s24 = smov [#allocation9]   ;;  %s299_s10 = int_to_ptr.hbm [resolvable:$true] %s298_s10 }
  0x1d   : > { %2139 = dma.hbm_to_vmem [thread:$0]  (!%p2560_p10), %s299_s10, 10240, %s301_s23, [#allocation7], %s2726_s26, %s2726_s26, %s2727_s1  }
  0x1e   : > { %s317_s27 = sshll.u32 %s2440_s24, 4  ;;  %s50_s22 = sadd.s32 1, %s2420_s13  ;;  %s318_s27 = int_to_ptr.vmem [resolvable:$true] %s317_s27 }
  0x1f   : > { %s41_s21 = sadd.s32 1, %s2428_s15  ;;  %p57_p12 = scmp.ne.s32.totalorder %s2420_s13, %s2416_s12 }
  0x20   : > { %p43_p13 = scmp.ge.s32.totalorder %s41_s21, 2  ;;  %p58_p0 = scmp.eq.s32.totalorder %s2432_s16, 0 }
  0x21   : > { %s315_s3 = sshll.u32 %s2743_s5, 4  ;;  %p2587_p3 = por %p2533_p2, %p57_p12  ;;  %s316_s3 = int_to_ptr.hbm [resolvable:$true] %s315_s3 }
  0x22   : > { %2142 = dma.hbm_to_vmem [thread:$0]  (!%p2560_p10), %s316_s3, 2048, %s318_s27, [#allocation10], %s2435_s8, %s2435_s8, %s2436_s17  }
  0x23   : > { %p2154_p5 = scmp.lt.s32.totalorder %s2432_s16, 2  ;;  %s2760_s21 = smov (%p43_p13, %s41_s21), 0 }
  0x24   : > { %2745 = sst [smem:[#allocation18_spill]] %s2760_s21  ;;  %p2594_p7 = por %p58_p0, %p57_p12 }
  0x25   : > { %s340_s3 = sand.u32 1, %s2420_s13   ;;  %s45_s28 = ssub.s32 %s2428_s15, %s2760_s21 }
  0x26   : > { %p48_p9 = scmp.eq.s32.totalorder %s45_s28, 0  ;;  %s1589_s8 = sshll.u32 %s340_s3, 4 }
  0x27   : > { %s2015_s17 = sshll.u32 %s2428_s15, 4  ;;  %s344_s27 = scalar_lea.vmem [#allocation3], %s1589_s8 }
  0x28   : > { %s2603_s19 = scalar_select %p48_p9, %s2420_s13, %s50_s22  }
  0x29   : > { %s351_s24 = scalar_lea.hbm %s2715_s0, %s2015_s17  ;;  %s354_s26 = sshll.u32 %s344_s27, 4  ;;  %s355_s26 = int_to_ptr.vmem [resolvable:$true] %s354_s26 }
  0x2a   : > { %s352_s1 = sshll.u32 %s351_s24, 4  ;;  %p2144_p2 = pnand %p2154_p5, %p2594_p7  ;;  %s353_s1 = int_to_ptr.hbm [resolvable:$true] %s352_s1 }
  0x2b   : > { %s341_s5 = scalar_lea.sflag [#allocation4], %s340_s3  ;;  %s2747_s11 = smov 8  }
  0x2c   : > { %s2748_s21 = smov 128   ;;  %366 = sbr.rel (%p2552_p8) target bundleno = 699 (0x2bb), region = 56 }
  0x2d   : > { %2146 = dma.hbm_to_vmem [thread:$0]  (!%p2144_p2), %s353_s1, 256, %s355_s26, %s341_s5, %s2748_s21, %s2748_s21, %s2747_s11  }
  0x2e   : > { %s2618_s22 = sand.u32 (!%p2552_p8), 1, %s2416_s12  }
  0x2f   : > { %s1593_s28 = sshll.u32 (!%p2552_p8), %s2618_s22, 4  ;;  %s369_s8 = scalar_lea.sflag (!%p2552_p8), [#allocation4], %s2618_s22 }
  0x30   : > { %s372_s17 = scalar_lea.vmem (!%p2552_p8), [#allocation3], %s1593_s28 }
  0x31   : > { %2395 = dma.done.wait (%p2539_p4), %s369_s8, 256  }
  0x32   : > { %2397 = vsyncadd (%p2539_p4), %s369_s8, 4294967040 }
  0x33   : > { %2399 = dma.done.wait (%p2529_p1), [#allocation7], 10880  }
  0x34   : > { %2401 = vsyncadd (%p2529_p1), [#allocation7], 4294956416 }
  0x35   : > { %2403 = dma.done.wait (%p2529_p1), [#allocation10], 2048  }
  0x36   : > { %2405 = vsyncadd (%p2529_p1), [#allocation10], 4294965248  ;;  %v2018_v1 = vld [vmem:[#allocation6 + $0x10] sm:$0xff]  ;;  %v2017_v2 = vld [vmem:[#allocation6 + $0x8] sm:$0xff]  ;;  %vm444_vm0 = vcmask 130048   ;;  %vm608_vm6 = vcmask 1046528   ;;  %s1471_s29 = scalar_lea.hbm %s2724_s9, %s2424_s14 }
  0x37   : > { %v2016_v3 = vld [vmem:[#allocation6] sm:$0xff]  ;;  %v424_v5 = vld [vmem:[%s372_s17 + $0x8] sm:$0xff]  ;;  %505 = vmatpush.bf16.msra.mxu2 %v2018_v1  ;;  %455 = vmatpush.bf16.msra.mxu0 %v2017_v2  ;;  %v2034_v13 = vld [vmem:[#allocation8 + $0x64] sm:$0xf0]  ;;  %vm613_vm7 = vcmask 1045504   ;;  %vm618_vm8 = vcmask 1044480  }
  0x38   : > { %v423_v4 = vld [vmem:[%s372_s17] sm:$0xff]  ;;  %v2019_v6 = vld [vmem:[#allocation6 + $0x18] sm:$0xff]  ;;  %477 = vmatpush.bf16.msra.mxu1 %v2016_v3  ;;  %v1672_v12 = vld [vmem:[#allocation8 + $0x60] sm:$0xf]  ;;  %vm623_vm9 = vcmask 1043456   ;;  %s421_s30 = scalar_lea.vmem [#allocation11], %s2618_s22 }
  0x39   : > { %v2634_v7 = vpack.c.bf16 %v424_v5, %v423_v4  ;;  %v2020_v8 = vld [vmem:[#allocation6 + $0x20] sm:$0xff]  ;;  %v1680_v9 = vld [vmem:[#allocation8 + $0x70] sm:$0xf]  ;;  %536 = vmatpush.bf16.msra.mxu3 %v2019_v6  ;;  %v1673_v17 = vor.u32 %v2034_v13, %v1672_v12  ;;  %v1736_v26 = vld [vmem:[#allocation8 + $0xe0] sm:$0xf]  ;;  %s1473_s24 = sshll.u32 %s421_s30, 4  ;;  %s1474_s24 = int_to_ptr.vmem [resolvable:$true] %s1473_s24 }
  0x3a   : > { %v2036_v10 = vld [vmem:[#allocation8 + $0x74] sm:$0xf0]  ;;  %v1664_v18 = vld [vmem:[#allocation8 + $0x50] sm:$0xf]  ;;  %v2050_v29 = vld [vmem:[#allocation8 + $0xe4] sm:$0xf0] }
  0x3b   : > { %v1681_v11 = vor.u32 %v2036_v10, %v1680_v9  ;;  %v488_v14 = vrot.slane %v2634_v7, 1  ;;  %v432_v15 = vshrl.u32 %v2634_v7, 16  ;;  %v434_v16 = vshll.u32 %v2634_v7, 16  ;;  %565 = vmatpush.bf16.msrb.mxu0 %v2020_v8  ;;  %v2032_v19 = vld [vmem:[#allocation8 + $0x54] sm:$0xf0]  ;;  %1606 = vmatmul.msk.bf16.vlgmr.msra.gmra.mxu1 %vm444_vm0, %v2634_v7  ;;  %s1475_s27 = sshll.u32 %s1471_s29, 4  ;;  %s1476_s27 = int_to_ptr.hbm [resolvable:$true] %s1475_s27 }
  0x3c   : > { %v1744_v20 = vld [vmem:[#allocation8 + $0xf0] sm:$0xf]  ;;  %v2052_v24 = vld [vmem:[#allocation8 + $0xf4] sm:$0xf0]  ;;  %v1665_v30 = vor.u32 %v2032_v19, %v1664_v18  ;;  %v1656_v31 = vld [vmem:[#allocation8 + $0x40] sm:$0xf]  ;;  %v1737_v32 = vor.u32 %v2050_v29, %v1736_v26 }
  0x3d   : > { %1119 = vmatpush.bf16.msrb.mxu1 %v1681_v11  ;;  %1611 = vmatmul.msk.bf16.vlgmr.msra.gmra.mxu2 %vm444_vm0, %v488_v14  ;;  %v436_v21 = vrot.slane %v434_v16, 1  ;;  %v517_v22 = vrot.slane %v432_v15, 1  ;;  %v518_v23 = vrot.slane %v434_v16, 2  ;;  %v1745_v25 = vor.u32 %v2052_v24, %v1744_v20  ;;  %v2030_v33 = vld [vmem:[#allocation8 + $0x44] sm:$0xf0]  ;;  %s1462_s14 = scalar_lea.sflag [#allocation5], %s2618_s22 }
  0x3e   : > { %v1728_v34 = vld [vmem:[#allocation8 + $0xd0] sm:$0xf]  ;;  %v2048_v35 = vld [vmem:[#allocation8 + $0xd4] sm:$0xf0]  ;;  %v1657_v43 = vor.u32 %v2030_v33, %v1656_v31  ;;  %v1720_v45 = vld [vmem:[#allocation8 + $0xc0] sm:$0xf] }
  0x3f   : > { %v437_v27 = vor.u32 %v436_v21, %v432_v15  ;;  %v519_v28 = vor.u32 %v518_v23, %v517_v22  ;;  %1132 = vmatpush.bf16.msrb.mxu2 %v1745_v25  ;;  %v1808_v36 = vld [vmem:[#allocation8 + $0x170] sm:$0xf]  ;;  %v2068_v37 = vld [vmem:[#allocation8 + $0x174] sm:$0xf0]  ;;  %v1729_v44 = vor.u32 %v2048_v35, %v1728_v34  ;;  %v2046_v46 = vld [vmem:[#allocation8 + $0xc4] sm:$0xf0] }
  0x40   : > { %v1872_v38 = vld [vmem:[#allocation8 + $0x1f0] sm:$0xf]  ;;  %v2028_v40 = vld [vmem:[#allocation8 + $0x34] sm:$0xf0]  ;;  %v1809_v41 = vor.u32 %v2068_v37, %v1808_v36  ;;  %v1800_v48 = vld [vmem:[#allocation8 + $0x160] sm:$0xf]  ;;  %v1721_v56 = vor.u32 %v2046_v46, %v1720_v45 }
  0x41   : > { %1120 = vmatpush.bf16.msrb.mxu1 %v1673_v17  ;;  %1601 = vmatmul.msk.bf16.vlgmr.msra.gmra.mxu0 %vm444_vm0, %v437_v27  ;;  %v1648_v39 = vld [vmem:[#allocation8 + $0x30] sm:$0xf]  ;;  %v2084_v42 = vld [vmem:[#allocation8 + $0x1f4] sm:$0xf0]  ;;  %v2066_v49 = vld [vmem:[#allocation8 + $0x164] sm:$0xf0] }
  0x42   : > { %1616 = vmatmul.msk.bf16.vlgmr.msra.gmra.mxu3 %vm444_vm0, %v519_v28  ;;  %v1873_v47 = vor.u32 %v2084_v42, %v1872_v38  ;;  %v1864_v50 = vld [vmem:[#allocation8 + $0x1e0] sm:$0xf]  ;;  %v2082_v51 = vld [vmem:[#allocation8 + $0x1e4] sm:$0xf0]  ;;  %v1801_v52 = vor.u32 %v2066_v49, %v1800_v48  ;;  %v1649_v54 = vor.u32 %v2028_v40, %v1648_v39  ;;  %v1712_v58 = vld [vmem:[#allocation8 + $0xb0] sm:$0xf] }
  0x43   : > { %1133 = vmatpush.bf16.msrb.mxu2 %v1737_v32  ;;  %1145 = vmatpush.bf16.msrb.mxu3 %v1809_v41  ;;  %v1865_v53 = vor.u32 %v2082_v51, %v1864_v50  ;;  %v1640_v55 = vld [vmem:[#allocation8 + $0x20] sm:$0xf]  ;;  %v2026_v57 = vld [vmem:[#allocation8 + $0x24] sm:$0xf0]  ;;  %v2044_v59 = vld [vmem:[#allocation8 + $0xb4] sm:$0xf0] }
  0x44   : > { %1158 = vmatpush.bf16.msra.mxu0 %v1873_v47  ;;  %v1641_v60 = vor.u32 %v2026_v57, %v1640_v55  ;;  %v1713_v61 = vor.u32 %v2044_v59, %v1712_v58  ;;  %v548_v62 = vrot.slane %v2634_v7, 2  ;;  %v1632_v63 = vld [vmem:[#allocation8 + $0x10] sm:$0xf]  ;;  %v2024_v0 = vld [vmem:[#allocation8 + $0x14] sm:$0xf0]  ;;  %s2356_s28 = sshra.s32 %s1476_s27, 4  ;;  %s2357_s28 = int_to_ptr.hbm [resolvable:$true] %s2356_s28 }
  0x45   : > { %1121 = vmatpush.bf16.msrb.mxu1 %v1665_v30  ;;  %v1633_v1 = vor.u32 %v2024_v0, %v1632_v63  ;;  %v1624_v2 = vld [vmem:[#allocation8] sm:$0xf]  ;;  %v2022_v3 = vld [vmem:[#allocation8 + $0x4] sm:$0xf0]  ;;  %v1936_v4 = vld [vmem:[#allocation8 + $0x270] sm:$0xf]  ;;  %p2363_p10 = scmp.lt.s32.totalorder %s2357_s28, %s2724_s9 }
  0x46   : > { %v2100_v5 = vld [vmem:[#allocation8 + $0x274] sm:$0xf0]  ;;  %v1625_v6 = vor.u32 %v2022_v3, %v1624_v2  ;;  %v1704_v9 = vld [vmem:[#allocation8 + $0xa0] sm:$0xf]  ;;  %v2042_v10 = vld [vmem:[#allocation8 + $0xa4] sm:$0xf0] }
  0x47   : > { %1134 = vmatpush.bf16.msrb.mxu2 %v1729_v44  ;;  %1146 = vmatpush.bf16.msrb.mxu3 %v1801_v52  ;;  %v1937_v8 = vor.u32 %v2100_v5, %v1936_v4  ;;  %v1705_v11 = vor.u32 %v2042_v10, %v1704_v9  ;;  %v1792_v7 = vld [vmem:[#allocation8 + $0x150] sm:$0xf]  ;;  %v2064_v12 = vld [vmem:[#allocation8 + $0x154] sm:$0xf0]  ;;  %v1928_v16 = vld [vmem:[#allocation8 + $0x260] sm:$0xf] }
  0x48   : > { %1159 = vmatpush.bf16.msra.mxu0 %v1865_v53  ;;  %v1856_v13 = vld [vmem:[#allocation8 + $0x1d0] sm:$0xf]  ;;  %v1793_v14 = vor.u32 %v2064_v12, %v1792_v7  ;;  %v2080_v15 = vld [vmem:[#allocation8 + $0x1d4] sm:$0xf0]  ;;  %v2098_v17 = vld [vmem:[#allocation8 + $0x264] sm:$0xf0] }
  0x49   : > { %1122 = vmatpush.bf16.msrb.mxu1 %v1657_v43  ;;  %v1857_v18 = vor.u32 %v2080_v15, %v1856_v13  ;;  %v1929_v19 = vor.u32 %v2098_v17, %v1928_v16  ;;  %v1696_v20 = vld [vmem:[#allocation8 + $0x90] sm:$0xf]  ;;  %v2040_v21 = vld [vmem:[#allocation8 + $0x94] sm:$0xf0]  ;;  %v1784_v23 = vld [vmem:[#allocation8 + $0x140] sm:$0xf] }
  0x4a   : > { %v1697_v22 = vor.u32 %v2040_v21, %v1696_v20  ;;  %v2062_v24 = vld [vmem:[#allocation8 + $0x144] sm:$0xf0]  ;;  %v1848_v25 = vld [vmem:[#allocation8 + $0x1c0] sm:$0xf]  ;;  %v1920_v28 = vld [vmem:[#allocation8 + $0x250] sm:$0xf] }
  0x4b   : > { %1135 = vmatpush.bf16.msrb.mxu2 %v1721_v56  ;;  %1147 = vmatpush.bf16.msrb.mxu3 %v1793_v14  ;;  %v1785_v26 = vor.u32 %v2062_v24, %v1784_v23  ;;  %v2078_v27 = vld [vmem:[#allocation8 + $0x1c4] sm:$0xf0]  ;;  %v2096_v29 = vld [vmem:[#allocation8 + $0x254] sm:$0xf0]  ;;  %v1688_v32 = vld [vmem:[#allocation8 + $0x80] sm:$0xf] }
  0x4c   : > { %1160 = vmatpush.bf16.msra.mxu0 %v1857_v18  ;;  %v1849_v30 = vor.u32 %v2078_v27, %v1848_v25  ;;  %v1921_v31 = vor.u32 %v2096_v29, %v1920_v28  ;;  %v2038_v33 = vld [vmem:[#allocation8 + $0x84] sm:$0xf0]  ;;  %v1776_v35 = vld [vmem:[#allocation8 + $0x130] sm:$0xf]  ;;  %v2060_v36 = vld [vmem:[#allocation8 + $0x134] sm:$0xf0] }
  0x4d   : > { %1123 = vmatpush.bf16.msrb.mxu1 %v1649_v54  ;;  %v1689_v34 = vor.u32 %v2038_v33, %v1688_v32  ;;  %v1840_v37 = vld [vmem:[#allocation8 + $0x1b0] sm:$0xf]  ;;  %v1777_v38 = vor.u32 %v2060_v36, %v1776_v35  ;;  %v2076_v39 = vld [vmem:[#allocation8 + $0x1b4] sm:$0xf0]  ;;  %v1912_v40 = vld [vmem:[#allocation8 + $0x240] sm:$0xf] }
  0x4e   : > { %v2094_v41 = vld [vmem:[#allocation8 + $0x244] sm:$0xf0]  ;;  %v1841_v42 = vor.u32 %v2076_v39, %v1840_v37  ;;  %v2035_v44 = vld [vmem:[#allocation8 + $0x74] sm:$0xf]  ;;  %v1682_v45 = vld [vmem:[#allocation8 + $0x78] sm:$0xf0] }
  0x4f   : > { %1136 = vmatpush.bf16.msrb.mxu2 %v1713_v61  ;;  %1148 = vmatpush.bf16.msrb.mxu3 %v1785_v26  ;;  %v1913_v43 = vor.u32 %v2094_v41, %v1912_v40  ;;  %v1685_v46 = vor.u32 %v2035_v44, %v1682_v45  ;;  %v1768_v47 = vld [vmem:[#allocation8 + $0x120] sm:$0xf]  ;;  %v2058_v48 = vld [vmem:[#allocation8 + $0x124] sm:$0xf0]  ;;  %v1904_v52 = vld [vmem:[#allocation8 + $0x230] sm:$0xf] }
  0x50   : > { %1161 = vmatpush.bf16.msra.mxu0 %v1849_v30  ;;  %v1832_v49 = vld [vmem:[#allocation8 + $0x1a0] sm:$0xf]  ;;  %v1769_v50 = vor.u32 %v2058_v48, %v1768_v47  ;;  %v2074_v51 = vld [vmem:[#allocation8 + $0x1a4] sm:$0xf0]  ;;  %v2092_v53 = vld [vmem:[#allocation8 + $0x234] sm:$0xf0] }
  0x51   : > { %1124 = vmatpush.bf16.msrb.mxu1 %v1641_v60  ;;  %1621 = vmatmul.msk.bf16.vlgmr.msrb.gmra.mxu0 %vm444_vm0, %v548_v62  ;;  %v1833_v54 = vor.u32 %v2074_v51, %v1832_v49  ;;  %v1905_v55 = vor.u32 %v2092_v53, %v1904_v52  ;;  %v2033_v56 = vld [vmem:[#allocation8 + $0x64] sm:$0xf]  ;;  %v1674_v57 = vld [vmem:[#allocation8 + $0x68] sm:$0xf0]  ;;  %v1760_v59 = vld [vmem:[#allocation8 + $0x110] sm:$0xf] }
  0x52   : > { %v1677_v58 = vor.u32 %v2033_v56, %v1674_v57  ;;  %v2056_v60 = vld [vmem:[#allocation8 + $0x114] sm:$0xf0]  ;;  %v1824_v61 = vld [vmem:[#allocation8 + $0x190] sm:$0xf]  ;;  %v1896_v0 = vld [vmem:[#allocation8 + $0x220] sm:$0xf] }
  0x53   : > { %1137 = vmatpush.bf16.msrb.mxu2 %v1705_v11  ;;  %1149 = vmatpush.bf16.msrb.mxu3 %v1777_v38  ;;  %v1761_v62 = vor.u32 %v2056_v60, %v1760_v59  ;;  %v2072_v63 = vld [vmem:[#allocation8 + $0x194] sm:$0xf0]  ;;  %v2031_v4 = vld [vmem:[#allocation8 + $0x54] sm:$0xf]  ;;  %v1666_v5 = vld [vmem:[#allocation8 + $0x58] sm:$0xf0] }
  0x54   : > { %1162 = vmatpush.bf16.msra.mxu0 %v1841_v42  ;;  %v1825_v2 = vor.u32 %v2072_v63, %v1824_v61  ;;  %v2054_v9 = vld [vmem:[#allocation8 + $0x104] sm:$0xf0]  ;;  %v1816_v10 = vld [vmem:[#allocation8 + $0x180] sm:$0xf]  ;;  %v1888_v12 = vld [vmem:[#allocation8 + $0x210] sm:$0xf] }
  0x55   : > { %1125 = vmatpush.bf16.msrb.mxu1 %v1633_v1  ;;  %v2090_v1 = vld [vmem:[#allocation8 + $0x224] sm:$0xf0]  ;;  %v2088_v13 = vld [vmem:[#allocation8 + $0x214] sm:$0xf0]  ;;  %v2029_v16 = vld [vmem:[#allocation8 + $0x44] sm:$0xf] }
  0x56   : > { %v1897_v3 = vor.u32 %v2090_v1, %v1896_v0  ;;  %v2070_v7 = vld [vmem:[#allocation8 + $0x184] sm:$0xf0]  ;;  %v1889_v15 = vor.u32 %v2088_v13, %v1888_v12  ;;  %v1658_v17 = vld [vmem:[#allocation8 + $0x48] sm:$0xf0]  ;;  %v2051_v18 = vld [vmem:[#allocation8 + $0xf4] sm:$0xf]  ;;  %v588_v1 = vlaneseq }
  0x57   : > { %1138 = vmatpush.bf16.msrb.mxu2 %v1697_v22  ;;  %1150 = vmatpush.bf16.msrb.mxu3 %v1769_v50  ;;  %v1817_v14 = vor.u32 %v2070_v7, %v1816_v10  ;;  %v1746_v20 = vld [vmem:[#allocation8 + $0xf8] sm:$0xf0]  ;;  %v2067_v21 = vld [vmem:[#allocation8 + $0x174] sm:$0xf]  ;;  %v1880_v25 = vld [vmem:[#allocation8 + $0x200] sm:$0xf] }
  0x58   : > { %1163 = vmatpush.bf16.msra.mxu0 %v1833_v54  ;;  %v1810_v22 = vld [vmem:[#allocation8 + $0x178] sm:$0xf0]  ;;  %v1749_v23 = vor.u32 %v2051_v18, %v1746_v20  ;;  %v2086_v26 = vld [vmem:[#allocation8 + $0x204] sm:$0xf0]  ;;  %v2027_v28 = vld [vmem:[#allocation8 + $0x34] sm:$0xf] }
  0x59   : > { %1126 = vmatpush.bf16.msrb.mxu1 %v1625_v6  ;;  %v1669_v6 = vor.u32 %v2031_v4, %v1666_v5  ;;  %v1813_v24 = vor.u32 %v2067_v21, %v1810_v22  ;;  %v1881_v27 = vor.u32 %v2086_v26, %v1880_v25  ;;  %v1650_v29 = vld [vmem:[#allocation8 + $0x38] sm:$0xf0]  ;;  %v2049_v30 = vld [vmem:[#allocation8 + $0xe4] sm:$0xf]  ;;  %v1738_v32 = vld [vmem:[#allocation8 + $0xe8] sm:$0xf0] }
  0x5a   : > { %v2065_v33 = vld [vmem:[#allocation8 + $0x164] sm:$0xf]  ;;  %v1802_v35 = vld [vmem:[#allocation8 + $0x168] sm:$0xf0]  ;;  %v2047_v40 = vld [vmem:[#allocation8 + $0xd4] sm:$0xf] }
  0x5b   : > { %1139 = vmatpush.bf16.msrb.mxu2 %v1689_v34  ;;  %1151 = vmatpush.bf16.msrb.mxu3 %v1761_v62  ;;  %v1741_v34 = vor.u32 %v2049_v30, %v1738_v32  ;;  %v1805_v36 = vor.u32 %v2065_v33, %v1802_v35  ;;  %v2025_v37 = vld [vmem:[#allocation8 + $0x24] sm:$0xf]  ;;  %v1642_v38 = vld [vmem:[#allocation8 + $0x28] sm:$0xf0]  ;;  %v1730_v41 = vld [vmem:[#allocation8 + $0xd8] sm:$0xf0] }
  0x5c   : > { %1164 = vmatpush.bf16.msra.mxu0 %v1825_v2  ;;  %v1645_v39 = vor.u32 %v2025_v37, %v1642_v38  ;;  %v1733_v42 = vor.u32 %v2047_v40, %v1730_v41  ;;  %v1794_v44 = vld [vmem:[#allocation8 + $0x158] sm:$0xf0]  ;;  %v2045_v50 = vld [vmem:[#allocation8 + $0xc4] sm:$0xf]  ;;  %v1722_v51 = vld [vmem:[#allocation8 + $0xc8] sm:$0xf0] }
  0x5d   : > { %1171 = vmatpush.bf16.msra.mxu1 %v1937_v8  ;;  %v1752_v8 = vld [vmem:[#allocation8 + $0x100] sm:$0xf]  ;;  %v1634_v47 = vld [vmem:[#allocation8 + $0x18] sm:$0xf0]  ;;  %v2061_v52 = vld [vmem:[#allocation8 + $0x144] sm:$0xf]  ;;  %v1725_v53 = vor.u32 %v2045_v50, %v1722_v51 }
  0x5e   : > { %v1753_v11 = vor.u32 %v2054_v9, %v1752_v8  ;;  %v1786_v54 = vld [vmem:[#allocation8 + $0x148] sm:$0xf0]  ;;  %v2021_v57 = vld [vmem:[#allocation8 + $0x4] sm:$0xf]  ;;  %v2043_v60 = vld [vmem:[#allocation8 + $0xb4] sm:$0xf] }
  0x5f   : > { %1184 = vmatpush.bf16.msra.mxu2 %v1685_v46  ;;  %v2023_v46 = vld [vmem:[#allocation8 + $0x14] sm:$0xf]  ;;  %v1714_v61 = vld [vmem:[#allocation8 + $0xb8] sm:$0xf0]  ;;  %v1706_v8 = vld [vmem:[#allocation8 + $0xa8] sm:$0xf0] }
  0x60   : > { %1152 = vmatpush.bf16.msrb.mxu3 %v1753_v11  ;;  %1165 = vmatpush.bf16.msra.mxu0 %v1817_v14  ;;  %v1637_v49 = vor.u32 %v2023_v46, %v1634_v47  ;;  %v2059_v62 = vld [vmem:[#allocation8 + $0x134] sm:$0xf]  ;;  %v1717_v63 = vor.u32 %v2043_v60, %v1714_v61  ;;  %v1778_v0 = vld [vmem:[#allocation8 + $0x138] sm:$0xf0]  ;;  %v2057_v9 = vld [vmem:[#allocation8 + $0x124] sm:$0xf] }
  0x61   : > { %1172 = vmatpush.bf16.msra.mxu1 %v1929_v19  ;;  %v1661_v19 = vor.u32 %v2029_v16, %v1658_v17  ;;  %v1781_v2 = vor.u32 %v2059_v62, %v1778_v0  ;;  %v1770_v7 = vld [vmem:[#allocation8 + $0x128] sm:$0xf0]  ;;  %v589_v12 = vshrl.u32 %v588_v1, 7  ;;  %v2039_v14 = vld [vmem:[#allocation8 + $0x94] sm:$0xf]  ;;  %vm1459_vm0 = vcmask 57344  }
  0x62   : > { %v1773_v13 = vor.u32 %v2057_v9, %v1770_v7  ;;  %v2055_v16 = vld [vmem:[#allocation8 + $0x114] sm:$0xf]  ;;  %v2037_v26 = vld [vmem:[#allocation8 + $0x84] sm:$0xf]  ;;  %v1754_v32 = vld [vmem:[#allocation8 + $0x108] sm:$0xf0] }
  0x63   : > { %1185 = vmatpush.bf16.msra.mxu2 %v1677_v58  ;;  %v1626_v58 = vld [vmem:[#allocation8 + $0x8] sm:$0xf0]  ;;  %v2083_v37 = vld [vmem:[#allocation8 + $0x1f4] sm:$0xf]  ;;  %v1874_v38 = vld [vmem:[#allocation8 + $0x1f8] sm:$0xf0] }
  0x64   : > { %1197 = vmatpush.bf16.msra.mxu3 %v1749_v23  ;;  %1210 = vmatpush.bf16.msrb.mxu0 %v1813_v24  ;;  %v1629_v59 = vor.u32 %v2021_v57, %v1626_v58  ;;  %v2216_v23 = vld [vmem:[%s2717_s2] ss:$0 sm:$0xff]  ;;  %v592_v24 = vadd.s32 4294967294, %v589_v12  ;;  %v590_v41 = vadd.s32 8, %v589_v12  ;;  %v2077_v60 = vld [vmem:[#allocation8 + $0x1c4] sm:$0xf] }
  0x65   : > { %1173 = vmatpush.bf16.msra.mxu1 %v1921_v31  ;;  %v1653_v31 = vor.u32 %v2027_v28, %v1650_v29  ;;  %v2053_v28 = vld [vmem:[#allocation8 + $0x104] sm:$0xf]  ;;  %v1850_v61 = vld [vmem:[#allocation8 + $0x1c8] sm:$0xf0]  ;;  %s2358_s8 = scalar_lea.hbm %s2357_s28, 1  ;;  %s2362_s5 = scalar_lea.hbm %s2724_s9, 2 }
  0x66   : > { %vm594_vm1 = vcmp.ge.s32.totalorder %v592_v24, 0  ;;  %v593_v51 = vadd.s32 4294967294, %v590_v41  ;;  %v1853_v9 = vor.u32 %v2077_v60, %v1850_v61  ;;  %v2101_v60 = vld [vmem:[#allocation9] sm:$0xff]  ;;  %v2115_v61 = vld [vmem:[#allocation9 + $0x70] sm:$0xff]  ;;  %p2359_p1 = scmp.ne.s32.totalorder %s2357_s28, %s2358_s8  ;;  %p2364_p12 = scmp.lt.s32.totalorder %s2362_s5, %s2358_s8 }
  0x67   : > { %1186 = vmatpush.bf16.msra.mxu2 %v1669_v6  ;;  %v2041_v6 = vld [vmem:[#allocation8 + $0xa4] sm:$0xf]  ;;  %vm2651_vm3 = vmpackc.low %vm594_vm1, %vm594_vm1 }
  0x68   : > { %1198 = vmatpush.bf16.msra.mxu3 %v1741_v34  ;;  %1211 = vmatpush.bf16.msrb.mxu0 %v1805_v36  ;;  %v1709_v11 = vor.u32 %v2041_v6, %v1706_v8  ;;  %v1757_v34 = vor.u32 %v2053_v28, %v1754_v32  ;;  %vm597_vm5 = vcmp.lt.s32.totalorder %v593_v51, 8  ;;  %v1938_v6 = vld [vmem:[#allocation8 + $0x278] sm:$0xf0]  ;;  %v2085_v51 = vld [vmem:[#allocation8 + $0x204] sm:$0xf]  ;;  %p2360_p4 = pnand %p2359_p1, %p2587_p3  ;;  %p2365_p13 = por %p2364_p12, %p2363_p10 }
  0x69   : > { %1174 = vmatpush.bf16.msra.mxu1 %v1913_v43  ;;  %v2063_v43 = vld [vmem:[#allocation8 + $0x154] sm:$0xf]  ;;  %v1922_v28 = vld [vmem:[#allocation8 + $0x258] sm:$0xf0] }
  0x6a   : > { %v1797_v45 = vor.u32 %v2063_v43, %v1794_v44  ;;  %v1826_v32 = vld [vmem:[#allocation8 + $0x198] sm:$0xf0]  ;;  %v2107_v44 = vld [vmem:[#allocation9 + $0x30] sm:$0xff]  ;;  %p2361_p8 = pneg %p2360_p4 }
  0x6b   : > { %1187 = vmatpush.bf16.msra.mxu2 %v1661_v19  ;;  %v1762_v19 = vld [vmem:[#allocation8 + $0x118] sm:$0xf0] }
  0x6c   : > { %1199 = vmatpush.bf16.msra.mxu3 %v1733_v42  ;;  %1212 = vmatpush.bf16.msrb.mxu0 %v1797_v45  ;;  %v1765_v21 = vor.u32 %v2055_v16, %v1762_v19  ;;  %v1877_v45 = vor.u32 %v2083_v37, %v1874_v38  ;;  %v2069_v37 = vld [vmem:[#allocation8 + $0x184] sm:$0xf]  ;;  %v1818_v38 = vld [vmem:[#allocation8 + $0x188] sm:$0xf0]  ;;  %p2366_p0 = pnand %p2365_p13, %p2361_p8 }
  0x6d   : > { %1175 = vmatpush.bf16.msra.mxu1 %v1905_v55  ;;  %v1789_v55 = vor.u32 %v2061_v52, %v1786_v54  ;;  %v2079_v54 = vld [vmem:[#allocation8 + $0x1d4] sm:$0xf]  ;;  %v1821_v41 = vor.u32 %v2069_v37, %v1818_v38 }
  0x6f   : > { %1188 = vmatpush.bf16.msra.mxu2 %v1653_v31 }
  0x70   : > { %1200 = vmatpush.bf16.msra.mxu3 %v1725_v53  ;;  %1213 = vmatpush.bf16.msrb.mxu0 %v1789_v55  ;;  %v1858_v55 = vld [vmem:[#allocation8 + $0x1d8] sm:$0xf0] }
  0x71   : > { %1176 = vmatpush.bf16.msra.mxu1 %v1897_v3 }
  0x73   : > { %1189 = vmatpush.bf16.msra.mxu2 %v1645_v39 }
  0x74   : > { %1201 = vmatpush.bf16.msra.mxu3 %v1717_v63  ;;  %1214 = vmatpush.bf16.msrb.mxu0 %v1781_v2  ;;  %v2099_v2 = vld [vmem:[#allocation8 + $0x274] sm:$0xf] }
  0x75   : > { %1177 = vmatpush.bf16.msra.mxu1 %v1889_v15  ;;  %v1698_v15 = vld [vmem:[#allocation8 + $0x98] sm:$0xf0]  ;;  %v1941_v16 = vor.u32 %v2099_v2, %v1938_v6  ;;  %v713_v2 = vld [vmem:[%s2719_s4] sm:$0x3] }
  0x76   : > { %v1701_v18 = vor.u32 %v2039_v14, %v1698_v15 }
  0x77   : > { %1190 = vmatpush.bf16.msra.mxu2 %v1637_v49  ;;  %v1866_v49 = vld [vmem:[#allocation8 + $0x1e8] sm:$0xf0] }
  0x78   : > { %1202 = vmatpush.bf16.msra.mxu3 %v1709_v11  ;;  %1215 = vmatpush.bf16.msrb.mxu0 %v1773_v13 }
  0x79   : > { %1178 = vmatpush.bf16.msra.mxu1 %v1881_v27  ;;  %v1690_v27 = vld [vmem:[#allocation8 + $0x88] sm:$0xf0] }
  0x7a   : > { %v1693_v31 = vor.u32 %v2037_v26, %v1690_v27  ;;  %v1834_v26 = vld [vmem:[#allocation8 + $0x1a8] sm:$0xf0]  ;;  %v2095_v27 = vld [vmem:[#allocation8 + $0x254] sm:$0xf] }
  0x7b   : > { %1191 = vmatpush.bf16.msra.mxu2 %v1629_v59  ;;  %v1861_v59 = vor.u32 %v2079_v54, %v1858_v55  ;;  %v2108_v54 = vld [vmem:[#allocation9 + $0x38] sm:$0xff]  ;;  %v2105_v55 = vld [vmem:[#allocation9 + $0x20] sm:$0xff] }
  0x7c   : > { %1203 = vmatpush.bf16.msra.mxu3 %v1701_v18  ;;  %1216 = vmatpush.bf16.msrb.mxu0 %v1765_v21  ;;  %v1842_v18 = vld [vmem:[#allocation8 + $0x1b8] sm:$0xf0]  ;;  %v1930_v21 = vld [vmem:[#allocation8 + $0x268] sm:$0xf0] }
  0x80   : > { %1204 = vmatpush.bf16.msra.mxu3 %v1693_v31  ;;  %1217 = vmatpush.bf16.msrb.mxu0 %v1757_v34  ;;  %v2071_v31 = vld [vmem:[#allocation8 + $0x194] sm:$0xf]  ;;  %v1914_v34 = vld [vmem:[#allocation8 + $0x248] sm:$0xf0] }
  0xb8   : > { %v479_v56 = vpop.f32.mrf.mxu1 }
  0xbe   : > { %v457_v48 = vpop.f32.mrf.mxu0 }
  0xbf   : > { %v480_v5 = vadd.f32 %v479_v56, %v457_v48  ;;  %v2081_v48 = vld [vmem:[#allocation8 + $0x1e4] sm:$0xf] }
  0xc0   : > { %v507_v3 = vpop.f32.mrf.mxu2  ;;  %v481_v20 = vpop.f32.mrf.mxu1  ;;  %v1869_v53 = vor.u32 %v2081_v48, %v1866_v49  ;;  %v2087_v48 = vld [vmem:[#allocation8 + $0x214] sm:$0xf]  ;;  %v1890_v49 = vld [vmem:[#allocation8 + $0x218] sm:$0xf0] }
  0xc1   : > { %v512_v17 = vadd.f32 %v507_v3, %v480_v5 }
  0xc5   : > { %v538_v10 = vpop.f32.mrf.mxu3 }
  0xc6   : > { %v459_v4 = vpop.f32.mrf.mxu0  ;;  %v543_v22 = vadd.f32 %v538_v10, %v512_v17  ;;  %v2075_v17 = vld [vmem:[#allocation8 + $0x1b4] sm:$0xf] }
  0xc7   : > { %v482_v29 = vadd.f32 %v481_v20, %v459_v4  ;;  %v2097_v20 = vld [vmem:[#allocation8 + $0x264] sm:$0xf] }
  0xc8   : > { %v509_v33 = vpop.f32.mrf.mxu2  ;;  %v1933_v24 = vor.u32 %v2097_v20, %v1930_v21 }
  0xc9   : > { %v513_v39 = vadd.f32 %v509_v33, %v482_v29  ;;  %v2093_v33 = vld [vmem:[#allocation8 + $0x244] sm:$0xf] }
  0xcd   : > { %v540_v36 = vpop.f32.mrf.mxu3 }
  0xce   : > { %v567_v25 = vpop.f32.mrf.mxu0  ;;  %v544_v42 = vadd.f32 %v540_v36, %v513_v39  ;;  %v1917_v36 = vor.u32 %v2093_v33, %v1914_v34  ;;  %v2091_v39 = vld [vmem:[#allocation8 + $0x234] sm:$0xf] }
  0xcf   : > { %v572_v30 = vadd.f32 %v567_v25, %v543_v22  ;;  %v1845_v22 = vor.u32 %v2075_v17, %v1842_v18  ;;  %v2073_v25 = vld [vmem:[#allocation8 + $0x1a4] sm:$0xf] }
  0xd0   : > { %v1837_v29 = vor.u32 %v2073_v25, %v1834_v26  ;;  %v716_v26 = vperm.slane %v713_v2, 1 }
  0xd1   : > { %v578_v35 = vadd.f32 %v2216_v23, %v572_v30  ;;  %v1925_v30 = vor.u32 %v2095_v27, %v1922_v28 }
  0xd3   : > { %vm580_vm2 = vcmp.ge.f32.partialorder %v578_v35, 0.0  ;;  %v582_v40 = vmul.f32 0.01, %v578_v35 }
  0xd5   : > { %v584_v43 = vsel %vm580_vm2, %v578_v35, %v582_v40  ;;  %v1829_v35 = vor.u32 %v2071_v31, %v1826_v32  ;;  %v1906_v40 = vld [vmem:[#allocation8 + $0x238] sm:$0xf0] }
  0xd6   : > { %v569_v46 = vpop.f32.mrf.mxu0  ;;  %v2655_v47 = vpack.c.bf16 %v584_v43, %v584_v43  ;;  %v604_v57 = vsel %vm594_vm1, %v584_v43, 0.0  ;;  %v2089_v43 = vld [vmem:[#allocation8 + $0x224] sm:$0xf] }
  0xd7   : > { %v573_v50 = vadd.f32 %v569_v46, %v544_v42  ;;  %v619_v63 = vrot.slane %v604_v57, 3  ;;  %v609_v0 = vrot.slane %v604_v57, 1  ;;  %v614_v1 = vrot.slane %v604_v57, 2 }
  0xd8   : > { %1944 = vmatmul.msk.bf16.vlgmr.msrb.gmra.mxu1 %vm2651_vm3, %v2655_v47  ;;  %v624_v10 = vrot.slane %v604_v57, 4  ;;  %v1909_v42 = vor.u32 %v2091_v39, %v1906_v40  ;;  %v2103_v57 = vld [vmem:[#allocation9 + $0x10] sm:$0xff] }
  0xd9   : > { %v579_v52 = vadd.f32 %v2216_v23, %v573_v50  ;;  %1223 = vmatpush.bf16.msrb.mxu1 %v1877_v45  ;;  %v1898_v45 = vld [vmem:[#allocation8 + $0x228] sm:$0xf0]  ;;  %v1893_v50 = vor.u32 %v2087_v48, %v1890_v49  ;;  %v2217_v49 = vld [vmem:[%s2721_s6] ss:$0 sm:$0xff] }
  0xda   : > { %v1901_v46 = vor.u32 %v2089_v43, %v1898_v45  ;;  %v1420_v45 = vld [vmem:[#allocation2] sm:$0x1] }
  0xdb   : > { %vm581_vm4 = vcmp.ge.f32.partialorder %v579_v52, 0.0  ;;  %v583_v56 = vmul.f32 0.01, %v579_v52 }
  0xdd   : > { %v585_v58 = vsel %vm581_vm4, %v579_v52, %v583_v56  ;;  %1224 = vmatpush.bf16.msrb.mxu1 %v1869_v53  ;;  %v1882_v52 = vld [vmem:[#allocation8 + $0x208] sm:$0xf0]  ;;  %v2104_v56 = vld [vmem:[#allocation9 + $0x18] sm:$0xff] }
  0xde   : > { %v605_v62 = vsel %vm597_vm5, %v585_v58, 0.0  ;;  %v1885_v53 = vor.u32 %v2085_v51, %v1882_v52  ;;  %v2102_v58 = vld [vmem:[#allocation9 + $0x8] sm:$0xff] }
  0xdf   : > { %v610_v3 = vrot.slane %v605_v62, 1  ;;  %v615_v4 = vrot.slane %v605_v62, 2  ;;  %v620_v5 = vrot.slane %v605_v62, 3  ;;  %v625_v8 = vrot.slane %v605_v62, 4 }
  0xe1   : > { %1225 = vmatpush.bf16.msrb.mxu1 %v1861_v59  ;;  %v611_v11 = vsel %vm608_vm6, %v609_v0, %v610_v3  ;;  %v616_v7 = vsel %vm613_vm7, %v614_v1, %v615_v4  ;;  %v621_v12 = vsel %vm618_vm8, %v619_v63, %v620_v5  ;;  %v626_v19 = vsel %vm623_vm9, %v624_v10, %v625_v8  ;;  %v2116_v59 = vld [vmem:[#allocation9 + $0x78] sm:$0xff]  ;;  %v2114_v63 = vld [vmem:[#allocation9 + $0x68] sm:$0xff]  ;;  %v2113_v0 = vld [vmem:[#allocation9 + $0x60] sm:$0xff] }
  0xe2   : > { %v629_v13 = vpack.c.bf16 %v611_v11, %v611_v11  ;;  %v630_v14 = vpack.c.bf16 %v616_v7, %v616_v7  ;;  %v631_v15 = vpack.c.bf16 %v621_v12, %v621_v12  ;;  %v632_v23 = vpack.c.bf16 %v626_v19, %v626_v19  ;;  %v2112_v3 = vld [vmem:[#allocation9 + $0x58] sm:$0xff]  ;;  %v2111_v4 = vld [vmem:[#allocation9 + $0x50] sm:$0xff]  ;;  %v2110_v7 = vld [vmem:[#allocation9 + $0x48] sm:$0xff] }
  0xe3   : > { %v715_v5 = vperm.slane %v713_v2, 0 }
  0xe4   : > { %1140 = vmatmul.bf16.vlgmr.msrb.gmra.mxu2 %v629_v13  ;;  %1153 = vmatmul.bf16.vlgmr.msrb.gmra.mxu3 %v630_v14 }
  0xe5   : > { %1166 = vmatmul.bf16.vlgmr.msra.gmra.mxu0 %v631_v15  ;;  %1226 = vmatpush.bf16.msrb.mxu1 %v1853_v9 }
  0xe6   : > { %1236 = vmatpush.bf16.msrb.mxu2 %v1941_v16  ;;  %1389 = vmatpush.bf16.msrb.mxu3 %v2108_v54 }
  0xe7   : > { %1402 = vmatpush.bf16.msra.mxu0 %v2116_v59 }
  0xe8   : > { %1179 = vmatmul.bf16.vlgmr.msra.gmra.mxu1 %v632_v23 }
  0xe9   : > { %1227 = vmatpush.bf16.msrb.mxu1 %v1845_v22 }
  0xea   : > { %1237 = vmatpush.bf16.msrb.mxu2 %v1933_v24  ;;  %1390 = vmatpush.bf16.msrb.mxu3 %v2107_v44 }
  0xeb   : > { %1403 = vmatpush.bf16.msra.mxu0 %v2115_v61 }
  0xed   : > { %1228 = vmatpush.bf16.msrb.mxu1 %v1837_v29 }
  0xee   : > { %1238 = vmatpush.bf16.msrb.mxu2 %v1925_v30 }
  0xef   : > { %1404 = vmatpush.bf16.msra.mxu0 %v2114_v63 }
  0xf1   : > { %1229 = vmatpush.bf16.msrb.mxu1 %v1829_v35 }
  0xf2   : > { %1239 = vmatpush.bf16.msrb.mxu2 %v1917_v36 }
  0xf3   : > { %1405 = vmatpush.bf16.msra.mxu0 %v2113_v0 }
  0xf4   : > { %1947 = vmatmul.msk.bf16.vlgmr.msra.gmra.mxu2 %vm2651_vm3, %v2655_v47  ;;  %1205 = vmatmul.bf16.vlgmr.msra.gmra.mxu3 %v629_v13  ;;  %v2106_v47 = vld [vmem:[#allocation9 + $0x28] sm:$0xff] }
  0xf5   : > { %1218 = vmatmul.bf16.vlgmr.msrb.gmra.mxu0 %v630_v14  ;;  %1230 = vmatpush.bf16.msrb.mxu1 %v1821_v41 }
  0xf6   : > { %1240 = vmatpush.bf16.msrb.mxu2 %v1909_v42  ;;  %1391 = vmatpush.bf16.msrb.mxu3 %v2106_v47 }
  0xf7   : > { %1406 = vmatpush.bf16.msra.mxu0 %v2112_v3 }
  0xf8   : > { %1231 = vmatmul.bf16.vlgmr.msrb.gmra.mxu1 %v631_v15  ;;  %v2109_v15 = vld [vmem:[#allocation9 + $0x40] sm:$0xff] }
  0xfa   : > { %1241 = vmatpush.bf16.msrb.mxu2 %v1901_v46  ;;  %1392 = vmatpush.bf16.msrb.mxu3 %v2105_v55  ;;  %v2441_v46 = vmov 0   ;;  %v1418_v55 = vld [vmem:[%s2722_s7] sm:$0x1] }
  0xfb   : > { %1407 = vmatpush.bf16.msra.mxu0 %v2111_v4  ;;  %2215 = vset.pattern.permute.xlu0 %v2441_v46 }
  0xfc   : > { %1423 = vperm.xlu0 %2215, %v1420_v45  }
  0xfe   : > { %1242 = vmatpush.bf16.msrb.mxu2 %v1893_v50  ;;  %1393 = vmatpush.bf16.msrb.mxu3 %v2104_v56 }
  0xff   : > { %1408 = vmatpush.bf16.msra.mxu0 %v2110_v7 }
 0x102   : > { %1243 = vmatpush.bf16.msrb.mxu2 %v1885_v53  ;;  %1394 = vmatpush.bf16.msrb.mxu3 %v2103_v57 }
 0x103   : > { %1409 = vmatpush.bf16.msra.mxu0 %v2109_v15 }
 0x105   : > { %1244 = vmatmul.bf16.vlgmr.msrb.gmra.mxu2 %v632_v23 }
 0x106   : > { %1395 = vmatpush.bf16.msrb.mxu3 %v2102_v58 }
 0x10a   : > { %1396 = vmatpush.bf16.msrb.mxu3 %v2101_v60 }
 0x155   : > { %v1128_v62 = vpop.f32.mrf.mxu1 }
 0x156   : > { %v1129_v9 = vadd.f32 %v1128_v62, %v715_v5 }
 0x15d   : > { %v1130_v1 = vpop.f32.mrf.mxu1 }
 0x162   : > { %v1167_v6 = vpop.f32.mrf.mxu0 }
 0x165   : > { %v1180_v8 = vpop.f32.mrf.mxu1 }
 0x167   : > { %v1141_v10 = vpop.f32.mrf.mxu2  ;;  %v1154_v11 = vpop.f32.mrf.mxu3 }
 0x168   : > { %v1142_v12 = vadd.f32 %v1141_v10, %v1129_v9 }
 0x16a   : > { %v1155_v13 = vadd.f32 %v1154_v11, %v1142_v12  ;;  %v1169_v14 = vpop.f32.mrf.mxu0 }
 0x16c   : > { %v1168_v16 = vadd.f32 %v1167_v6, %v1155_v13 }
 0x16d   : > { %v1182_v17 = vpop.f32.mrf.mxu1 }
 0x16e   : > { %v1181_v18 = vadd.f32 %v1180_v8, %v1168_v16  ;;  %v1424_v56 = vpop.permute.xlu0 %1423 }
 0x16f   : > { %v1143_v19 = vpop.f32.mrf.mxu2  ;;  %v1156_v20 = vpop.f32.mrf.mxu3  ;;  %v1426_v57 = vperm.slane %v1424_v56, 0 }
 0x170   : > { %vm1249_vm10 = vcmp.ge.f32.partialorder %v1181_v18, 0.0  ;;  %v1251_v21 = vmul.f32 0.01, %v1181_v18 }
 0x172   : > { %v1219_v22 = vpop.f32.mrf.mxu0  ;;  %v1253_v23 = vsel %vm1249_vm10, %v1181_v18, %v1251_v21 }
 0x173   : > { %v1255_v24 = vpack.c.bf16 %v1253_v23, %v1253_v23 }
 0x175   : > { %v1232_v25 = vpop.f32.mrf.mxu1  ;;  %1397 = vmatmul.bf16.vlgmr.msrb.gmra.mxu3 %v1255_v24 }
 0x177   : > { %v1193_v27 = vpop.f32.mrf.mxu2  ;;  %v1206_v28 = vpop.f32.mrf.mxu3 }
 0x178   : > { %v1194_v30 = vadd.f32 %v1193_v27, %v716_v26 }
 0x17a   : > { %v1221_v29 = vpop.f32.mrf.mxu0  ;;  %v1207_v32 = vadd.f32 %v1206_v28, %v1194_v30 }
 0x17c   : > { %v1220_v35 = vadd.f32 %v1219_v22, %v1207_v32 }
 0x17d   : > { %v1234_v31 = vpop.f32.mrf.mxu1 }
 0x17e   : > { %v1233_v36 = vadd.f32 %v1232_v25, %v1220_v35 }
 0x17f   : > { %v1195_v33 = vpop.f32.mrf.mxu2  ;;  %v1208_v34 = vpop.f32.mrf.mxu3 }
 0x188   : > { %v1245_v37 = vpop.f32.mrf.mxu2 }
 0x189   : > { %v1246_v38 = vadd.f32 %v1245_v37, %v1233_v36 }
 0x18b   : > { %vm1250_vm11 = vcmp.ge.f32.partialorder %v1246_v38, 0.0  ;;  %v1252_v39 = vmul.f32 0.01, %v1246_v38 }
 0x18d   : > { %v1254_v40 = vsel %vm1250_vm11, %v1246_v38, %v1252_v39 }
 0x18e   : > { %v1256_v41 = vpack.c.bf16 %v1254_v40, %v1254_v40 }
 0x190   : > { %v1247_v42 = vpop.f32.mrf.mxu2  ;;  %1410 = vmatmul.bf16.vlgmr.msra.gmra.mxu0 %v1256_v41 }
 0x1f8   : > { %v1398_v43 = vpop.f32.mrf.mxu3 }
 0x1f9   : > { %v1399_v50 = vadd.f32 %v2217_v49, %v1398_v43 }
 0x200   : > { %v1400_v48 = vpop.f32.mrf.mxu3 }
 0x20d   : > { %v1411_v51 = vpop.f32.mrf.mxu0 }
 0x20e   : > { %v1412_v52 = vadd.f32 %v1411_v51, %v1399_v50 }
 0x210   : > { %vm1415_vm12 = vcmp.ge.f32.partialorder %v1412_v52, 0.0  ;;  %v1416_v53 = vmul.f32 0.01, %v1412_v52 }
 0x212   : > { %v1417_v54 = vsel %vm1415_vm12, %v1412_v52, %v1416_v53 }
 0x213   : > { %v1419_v44 = vpack.c.bf16 %v1417_v54, %v1417_v54 }
 0x215   : > { %v1413_v47 = vpop.f32.mrf.mxu0  ;;  %1434 = vmatpush.bf16.xpose.msra.mxu1 %v1419_v44 }
 0x21c   : > { %1435 = vmatmul.bf16.vlgmr.msra.gmra.mxu1 %v1418_v55 }
 0x299   : > { %v1436_v58 = vpop.f32.mrf.mxu1 }
 0x29a   : > { %v1437_v59 = vadd.f32 %v1436_v58, %v1426_v57 }
 0x29c   : > { %v2012_v60 = vmul.f32 -1.442695, %v1437_v59 }
 0x29e   : > { %2218 = vpow2.f32 %v2012_v60 }
 0x2a1   : > { %v1438_v61 = vpop.f32.mrf.mxu1 }
 0x2a4   : > { %v2219_v62 = vpop.eup %2218 }
 0x2a5   : > { %v1443_v63 = vadd.f32 1.0, %v2219_v62 }
 0x2a7   : > { %2220 = vrcp.f32 %v1443_v63  ;;  %v1455_v3 = vand.u32 2147483648, %v1443_v63  ;;  %v1453_v5 = vand.u32 2147483647, %v1443_v63  ;;  %vm1449_vm14 = vweird.f32 %v1443_v63 }
 0x2a9   : > { %v1456_v8 = vor.u32 1.1754944e-38, %v1455_v3  ;;  %vm1454_vm1 = vcmp.eq.f32.partialorder %v1453_v5, 8.507059e+37 }
 0x2ad   : > { %v2221_v0 = vpop.eup %2220 }
 0x2ae   : > { %v1445_v1 = vmul.f32 %v2221_v0, %v1443_v63  ;;  %vm1450_vm13 = vweird.f32 %v2221_v0 }
 0x2af   : > { %vm1451_vm15 = vmor %vm1449_vm14, %vm1450_vm13 }
 0x2b0   : > { %v1446_v2 = vsub.f32 1.0, %v1445_v1 }
 0x2b2   : > { %v1447_v4 = vmul.f32 %v2221_v0, %v1446_v2 }
 0x2b4   : > { %v1448_v6 = vadd.f32 %v2221_v0, %v1447_v4 }
 0x2b6   : > { %v1452_v9 = vsel %vm1451_vm15, %v2221_v0, %v1448_v6 }
 0x2b7   : > { %v1457_v10 = vsel %vm1454_vm1, %v1456_v8, %v1452_v9 }
 0x2b8   : > { %1460 = vst.msk [vmem:[%s421_s30] sm:$0x1] %vm1459_vm0, %v1457_v10 }
 0x2b9   : > { %2369 = shalt.err (!%p2366_p0)
}
 0x2ba   : > { %2131 = dma.vmem_to_hbm [thread:$0]  (%p2587_p3), %s1474_s24, 16, %s1476_s27, %s1462_s14  }
 0x2bb PF: > { %s2751_s22 = sld [smem:[#allocation16_spill]]  ;;  %p2148_p5 = pnand %p1588_p11, %p2544_p6 }
 0x2bd   : > { %p2149_p7 = pneg %p2148_p5 }
 0x2c1   : > { %s1487_s21 = sand.u32 1, %s2751_s22  }
 0x2c2   : > { %s1488_s25 = scalar_lea.sflag [#allocation5], %s1487_s21 }
 0x2c3   : > { %2407 = dma.done.wait (%p2149_p7), %s1488_s25, 16  }
 0x2c4   : > { %2409 = vsyncadd (%p2149_p7), %s1488_s25, 4294967280  ;;  %s29_s16 = sadd.s32 1, %s2432_s16   ;;  %s2753_s10 = sld [smem:[#allocation18_spill]] }
 0x2c5   : > { %p26_p9 = scmp.ge.s32.totalorder %s29_s16, 4   ;;  %s2754_s11 = smov %s2416_s12 }
 0x2c6   : > { %s2755_s12 = smov %s2420_s13  ;;  %s2756_s13 = smov %s2603_s19 }
 0x2c7   : > { %s2757_s14 = smov %s2428_s15  ;;  %28 = sbr.rel (!%p26_p9) target bundleno = 12 (0xc), region = 117 }
 0x2ca   : > { %s2758_s15 = smov %s2753_s10 }
 0x2cc   :  { %1493 = vsyncpa [#allocation4], 1 }
 0x2cd   :  { %1495 = vsyncpa [#allocation4 + $0x1], 1 }
 0x2ce   :  { %1496 = vsyncpa [#allocation7], 1 }
 0x2cf   :  { %1497 = vsyncpa [#allocation10], 1 }
 0x2d0   :  { %1498 = vsyncpa [#allocation5], 1 }
 0x2d1   :  { %1500 = vsyncpa [#allocation5 + $0x1], 1 }

</bundles_post_ra>
